<compile_context>
chip_gen: v6e
topology: v6e:2x2x1
jax: 0.10.0
libtpu: 0.0.40
codegen_flags: <defaults>
</compile_context>

<pallas_src>
import functools
import math

import jax
import jax.numpy as jnp
from jax import lax
from jax.experimental import pallas as pl
from jax.experimental.pallas import tpu as pltpu


def _sinpos_kernel(time_ref, freqs_ref, out_ref, *, half_dim: int, split_stores: bool):
    """Sinusoidal embedding for one batch tile.

    time_ref : (TB, 1)  f32  — time values for this row tile
    freqs_ref: (1, half_dim) f32 if split_stores else (1, 2*half_dim) f32
    out_ref  : (TB, 2*half_dim) f32 — layout [sin | cos]
    """
    t = time_ref[...]  # (TB, 1)

    if split_stores:
        # half_dim is a multiple of 128: both half stores are lane-aligned and
        # unmasked, and we only compute sin/cos once each (1x EUP work).
        arg = t * freqs_ref[...]                      # (TB, half_dim)
        out_ref[:, :half_dim] = jnp.sin(arg)
        out_ref[:, half_dim:] = jnp.cos(arg)
    else:
        # Full-width lane-dense path: freqs are tiled [f | f], and a per-lane
        # iota selects sin (lanes < half_dim) vs cos (lanes >= half_dim).
        # One single contiguous store, no unaligned offset, no XLU shuffle.
        arg = t * freqs_ref[...]                      # (TB, 2*half_dim)
        col = lax.broadcasted_iota(jnp.int32, arg.shape, 1)
        out_ref[...] = jnp.where(col < half_dim, jnp.sin(arg), jnp.cos(arg))


def sin_position_embedding(
    time: jax.Array,
    emblen: int,
    *,
    max_block_rows: int = 1024,
    vmem_budget_bytes: int = 8 * 1024 * 1024,
) -> jax.Array:
    """JAX/Pallas equivalent of SinPositionEmbedding.forward."""
    # Accept (B,) or (B, 1), like the PyTorch module.
    if time.ndim == 2 and time.shape[-1] == 1:
        time = time.reshape((time.shape[0],))
    assert time.ndim == 1, f"expected 1-D time, got shape {time.shape}"
    # PyTorch itself divides by zero for emblen in {2, 3}; we reject it explicitly.
    assert emblen >= 4, "emblen must be >= 4 (half_dim - 1 appears in a denominator)"

    b = time.shape[0]
    half_dim = emblen // 2
    w = 2 * half_dim  # kernel always writes an even width; odd emblen pads outside

    # Compile-time-constant frequency table (constant-folded by XLA).
    scale = math.log(10000.0) / (half_dim - 1)
    freqs = jnp.exp(jnp.arange(half_dim, dtype=jnp.float32) * (-scale))

    split_stores = (half_dim % 128 == 0)
    if split_stores:
        freqs_in = freqs.reshape(1, half_dim)
    else:
        freqs_in = jnp.concatenate([freqs, freqs]).reshape(1, w)

    time2d = time.astype(jnp.float32).reshape(b, 1)

    # ---- row-tile selection -------------------------------------------------
    # VMEM cap: the output tile is double-buffered (2 * tb * w * 4 bytes); keep
    # it inside a modest budget so large batches / wide emblen stay safe on
    # v7x's smaller (64 MiB physical / 32 MiB scoped) VMEM.
    vmem_cap_rows = max(8, ((vmem_budget_bytes // (2 * w * 4)) // 8) * 8)
    # Aim for >= 2 grid steps once b > 8 so the batch axis can shard across both
    # TensorCores on v7x; harmless on v5e/v6e (single TC).
    half_batch_rows = max(8, ((pl.cdiv(b, 2) + 7) // 8) * 8)
    tb = min(max(8, max_block_rows), vmem_cap_rows, half_batch_rows)
    grid = (pl.cdiv(b, tb),)

    kernel = functools.partial(
        _sinpos_kernel, half_dim=half_dim, split_stores=split_stores
    )

    out = pl.pallas_call(
        kernel,
        out_shape=jax.ShapeDtypeStruct((b, w), jnp.float32),
        grid=grid,
        in_specs=[
            pl.BlockSpec((tb, 1), lambda i: (i, 0)),
            pl.BlockSpec(freqs_in.shape, lambda i: (0, 0)),
        ],
        out_specs=pl.BlockSpec((tb, w), lambda i: (i, 0)),
        compiler_params=pltpu.CompilerParams(dimension_semantics=("parallel",)),
    )(time2d, freqs_in)

    if emblen % 2 == 1:
        # F.pad(emb, (0, 1, 0, 0)): one trailing zero column, added outside the
        # kernel so every in-kernel store stays full-width.
        out = jnp.pad(out, ((0, 0), (0, 1)))
    return out


def _reference(time: jax.Array, emblen: int) -> jax.Array:
    """Pure-JAX reference mirroring the PyTorch forward exactly."""
    if time.ndim == 2 and time.shape[-1] == 1:
        time = time.reshape((time.shape[0],))
    half_dim = emblen // 2
    emb = math.log(10000.0) / (half_dim - 1)
    emb = jnp.exp(jnp.arange(half_dim, dtype=jnp.float32) * -emb)
    emb = time.astype(jnp.float32)[:, None] * emb[None, :]
    emb = jnp.concatenate([jnp.sin(emb), jnp.cos(emb)], axis=1)
    if emblen % 2 == 1:
        emb = jnp.pad(emb, ((0, 0), (0, 1)))
    return emb


def _check(time, emblen, **kwargs):
    out = jax.block_until_ready(sin_position_embedding(time, emblen, **kwargs))
    ref = _reference(time, emblen)
    assert out.shape == ref.shape and out.dtype == jnp.float32
    assert jnp.allclose(out, ref, atol=1e-5, rtol=1e-5), f"mismatch emblen={emblen}"
    return out


if __name__ == "__main__":
    key = jax.random.PRNGKey(0)
    k1, k2, k3 = jax.random.split(key, 3)

    # 1) emblen=128 (half_dim=64): full-width select path, single unmasked
    #    lane-dense store; (B, 1)-shaped input like the PyTorch module accepts.
    t1 = jax.random.uniform(k1, (8, 1), dtype=jnp.float32) * 1000.0
    _check(t1, 128)

    # 2) emblen=256 (half_dim=128): split-store path, both halves 128-aligned;
    #    batch 16 -> tb=8, grid=(2,) exercises the pipelined/parallel grid.
    t2 = jax.random.uniform(k2, (16,), dtype=jnp.float32) * 1000.0
    _check(t2, 256)

    # 3) Odd emblen: trailing zero column added in the wrapper.
    _check(t1, 33)

    # 4) Small emblen (< 128): still correct; stores are inherently sub-lane here.
    _check(t1, 32)

    # 5) Ragged batch (not a multiple of the row tile): partial last grid step.
    t3 = jax.random.uniform(k3, (36,), dtype=jnp.float32) * 1000.0
    _check(t3, 128)

    print("KERNEL_OK")
</pallas_src>

<mosaic_0001>
module attributes {stable_mosaic.version = 11 : i64} {
  func.func @_sinpos_kernel(%arg0: i32, %arg1: memref<8x1xf32, #tpu.memory_space<vmem>>, %arg2: memref<1x128xf32, #tpu.memory_space<vmem>>, %arg3: memref<8x128xf32, #tpu.memory_space<vmem>>) attributes {dimension_semantics = [#tpu.dimension_semantics<parallel>], iteration_bounds = array<i64: 1>, scalar_prefetch = 0 : i64, scratch_operands = 0 : i64, tpu.core_type = #tpu.core_type<tc>, window_params = [{transform_indices = @transform_0, window_bounds = array<i64: 8, 1>}, {pipeline_mode = #tpu.pipeline_mode<synchronous>, transform_indices = @transform_1, window_bounds = array<i64: 1, 128>}, {transform_indices = @transform_2, window_bounds = array<i64: 8, 128>}]} {
    %c0 = arith.constant 0 : index
    %c0_0 = arith.constant 0 : index
    %0 = vector.load %arg1[%c0, %c0_0] : memref<8x1xf32, #tpu.memory_space<vmem>>, vector<8x1xf32>
    %c0_1 = arith.constant 0 : index
    %c0_2 = arith.constant 0 : index
    %1 = vector.load %arg2[%c0_1, %c0_2] : memref<1x128xf32, #tpu.memory_space<vmem>>, vector<1x128xf32>
    %2 = vector.broadcast %0 : vector<8x1xf32> to vector<8x128xf32>
    %3 = vector.broadcast %1 : vector<1x128xf32> to vector<8x128xf32>
    %4 = arith.mulf %2, %3 : vector<8x128xf32>
    %5 = tpu.iota {dimensions = array<i32: 1>} : vector<8x128xi32>
    %c64_i32 = arith.constant 64 : i32
    %6 = vector.broadcast %c64_i32 : i32 to vector<8x128xi32>
    %7 = arith.cmpi slt, %5, %6 : vector<8x128xi32>
    %8 = math.sin %4 : vector<8x128xf32>
    %9 = math.cos %4 : vector<8x128xf32>
    %10 = arith.select %7, %8, %9 : vector<8x128xi1>, vector<8x128xf32>
    %c0_3 = arith.constant 0 : index
    %c0_4 = arith.constant 0 : index
    %11 = vector.load %arg3[%c0_3, %c0_4] : memref<8x128xf32, #tpu.memory_space<vmem>>, vector<8x128xf32>
    tpu.vector_store %arg3[%c0_3, %c0_4], %10 {strides = array<i32>} : memref<8x128xf32, #tpu.memory_space<vmem>>, vector<8x128xf32>,
    return
  }
  func.func @transform_0(%arg0: i32) -> (i32, i32) {
    %c0_i32 = arith.constant 0 : i32
    %c0_i32_0 = arith.constant 0 : i32
    return %arg0, %c0_i32 : i32, i32
  }
  func.func @transform_1(%arg0: i32) -> (i32, i32) {
    %c0_i32 = arith.constant 0 : i32
    %c0_i32_0 = arith.constant 0 : i32
    %c0_i32_1 = arith.constant 0 : i32
    return %c0_i32, %c0_i32_0 : i32, i32
  }
  func.func @transform_2(%arg0: i32) -> (i32, i32) {
    %c0_i32 = arith.constant 0 : i32
    %c0_i32_0 = arith.constant 0 : i32
    return %arg0, %c0_i32 : i32, i32
  }
}

</mosaic_0001>

<bundles_post_ra>
// kernel: tpu_custom_call.1
= control target key start
LH: loop header
LB: loop body
LE: loop exit
PB: predicated region body
PF: predicated region fallthrough
CT: control target
= control target key end

     0   :  { %v300_v1 = vmov 0   ;;  %s354_s0 = inlined_call_operand.vmem [shape: f32[8,1], index: 0, kind: input, shape index: {}]   ;;  %s355_s1 = inlined_call_operand.vmem [shape: f32[1,128], index: 1, kind: input, shape index: {}]   ;;  %s356_s2 = inlined_call_operand.hbm [shape: f32[8,128], index: 2, kind: output, shape index: {}]  }
   0x1   :  { %v12_v0 = vld [vmem:[%s354_s0] sm:$0xff]  ;;  %273 = vset.pattern.permute.xlu0 %v300_v1 }
   0x2   :  { %16 = vperm.xlu0 %273, %v12_v0  }
   0x3   :  { %7 = vsyncpa [#allocation3], 0  ;;  %v252_v2 = vld [vmem:[%s355_s1] ss:$0 sm:$0xff]  ;;  %v301_v15 = vmov 683565275  }
   0x4   :  { %v302_v17 = vmov 2475754826   ;;  %v303_v20 = vmov 2131351028   ;;  %v304_v23 = vmov 2102212464  }
   0x5   :  { %v305_v26 = vmov 920167782   ;;  %v306_v29 = vmov 1326507024   ;;  %s307_s0 = smov [#allocation2]  }
   0x6   :  { %s244_s1 = sshll.u32 %s307_s0, 4  ;;  %s245_s1 = int_to_ptr.vmem [resolvable:$true] %s244_s1 }
   0x7   :  { %s278_s13 = scalar_lea.vmem %s245_s1, 128  ;;  %p283_p1 = scmp.lt.s32.totalorder %s245_s1, %s245_s1 }
   0x8   :  { %p279_p0 = scmp.ne.s32.totalorder %s245_s1, %s278_s13  ;;  %p284_p2 = scmp.lt.s32.totalorder %s278_s13, %s278_s13 }
   0xa   :  { %p285_p3 = por %p284_p2, %p283_p1 }
   0xc   :  { %p286_p4 = pnand %p285_p3, %p279_p0 }
  0x7d   :  { %v17_v3 = vpop.permute.xlu0 %16 }
  0x7e   :  { %v329_v4 = vmul.f32 %v252_v2, %v17_v3 }
  0x80   :  { %v32_v5 = vand.u32 2139095040, %v329_v4  ;;  %v29_v9 = vand.u32 2147483647, %v329_v4  ;;  %vm31_vm7 = vcmp.lt.s32.totalorder %v329_v4, 0 }
  0x82   :  { %v33_v6 = vshrl.u32 %v32_v5, 23  ;;  %v36_v12 = vand.u32 8388607, %v29_v9  ;;  %vm30_vm8 = vcmp.le.f32.partialorder %v29_v9, 0.7853982 }
  0x84   :  { %v253_v7 = vadd.s32 4294967169, %v33_v6  ;;  %v37_v31 = vor.u32 8388608, %v36_v12 }
  0x86   :  { %v39_v8 = vadd.s32 1, %v253_v7  ;;  %v77_v45 = vshll.u32 %v37_v31, 8 }
  0x88   :  { %vm40_vm0 = vcmp.gt.s32.totalorder %v39_v8, 0 }
  0x89   :  { %v41_v10 = vsel %vm40_vm0, %v39_v8, 0  ;;  %vm121_vm0 = vweird.f32 %v329_v4 }
  0x8a   :  { %v43_v11 = vand.u32 31, %v41_v10  ;;  %v42_v14 = vshrl.u32 %v41_v10, 5 }
  0x8c   :  { %v44_v13 = vsub.s32 32, %v43_v11  ;;  %v46_v16 = vshll.u32 %v301_v15, %v43_v11  ;;  %v49_v18 = vshll.u32 %v302_v17, %v43_v11  ;;  %v52_v22 = vshll.u32 %v303_v20, %v43_v11 }
  0x8d   :  { %v55_v25 = vshll.u32 %v304_v23, %v43_v11  ;;  %v58_v28 = vshll.u32 %v305_v26, %v43_v11  ;;  %vm61_vm1 = vcmp.lt.s32.totalorder %v42_v14, 1  ;;  %vm64_vm2 = vcmp.lt.s32.totalorder %v42_v14, 4 }
  0x8e   :  { %v47_v19 = vshrl.u32 %v302_v17, %v44_v13  ;;  %v50_v21 = vshrl.u32 %v303_v20, %v44_v13  ;;  %v53_v24 = vshrl.u32 %v304_v23, %v44_v13  ;;  %v56_v27 = vshrl.u32 %v305_v26, %v44_v13 }
  0x8f   :  { %v59_v30 = vshrl.u32 %v306_v29, %v44_v13  ;;  %v45_v40 = vshrl.u32 %v301_v15, %v44_v13  ;;  %vm63_vm3 = vcmp.lt.s32.totalorder %v42_v14, 3  ;;  %vm62_vm4 = vcmp.lt.s32.totalorder %v42_v14, 2 }
  0x90   :  { %v48_v32 = vor.u32 %v47_v19, %v46_v16  ;;  %v51_v33 = vor.u32 %v50_v21, %v49_v18  ;;  %v54_v34 = vor.u32 %v53_v24, %v52_v22  ;;  %v57_v35 = vor.u32 %v56_v27, %v55_v25 }
  0x91   :  { %v60_v36 = vor.u32 %v59_v30, %v58_v28  ;;  %v26_v24 = vlaneseq }
  0x92   :  { %v66_v37 = vsel %vm64_vm2, %v54_v34, 2102212464  ;;  %v69_v38 = vsel %vm61_vm1, %v48_v32, %v51_v33  ;;  %v73_v39 = vsel %vm61_vm1, %v51_v33, %v54_v34  ;;  %v70_v41 = vsel %vm64_vm2, %v57_v35, 920167782 }
  0x93   :  { %v74_v42 = vsel %vm64_vm2, %v60_v36, 1326507024  ;;  %v71_v43 = vsel %vm63_vm3, %v54_v34, %v70_v41  ;;  %v65_v46 = vsel %vm61_vm1, %v45_v40, %v48_v32  ;;  %v67_v47 = vsel %vm63_vm3, %v51_v33, %v66_v37 }
  0x94   :  { %v75_v44 = vsel %vm63_vm3, %v57_v35, %v74_v42  ;;  %v72_v48 = vsel %vm62_vm4, %v69_v38, %v71_v43  ;;  %v68_v54 = vsel %vm62_vm4, %v65_v46, %v67_v47  ;;  %v27_v26 = vand.u32 127, %v26_v24 }
  0x95   :  { %v76_v49 = vsel %vm62_vm4, %v73_v39, %v75_v44  ;;  %v338_v52 = vmul.u32.u64.low %v77_v45, %v72_v48  ;;  %v339_v53 = vmul.u32.u64.high %v77_v45, %v72_v48, %v338_v52  ;;  %v84_v56 = vmul.u32 %v77_v45, %v68_v54 }
  0x96   :  { %v335_v50 = vmul.u32.u64.low %v77_v45, %v76_v49  ;;  %v336_v51 = vmul.u32.u64.high %v77_v45, %v76_v49, %v335_v50  ;;  %vm28_vm9 = vcmp.lt.s32.totalorder %v27_v26, 64 }
  0x97   :  { %v87_v55 = vadd.s32 1, %v339_v53 }
  0x98   :  { %vm86_vm5 = vc.u32 %v336_v51, %v338_v52  ;;  %v85_v5 = vadd.s32 %v338_v52, %v336_v51 }
  0x99   :  { %v88_v57 = vsel %vm86_vm5, %v87_v55, %v339_v53 }
  0x9a   :  { %v89_v58 = vadd.s32 %v88_v57, %v84_v56 }
  0x9c   :  { %v90_v59 = vadd.s32 536870912, %v89_v58 }
  0x9e   :  { %v91_v60 = vshrl.u32 %v90_v59, 30 }
  0xa0   :  { %v92_v61 = vshll.u32 %v91_v60, 30  ;;  %v115_v19 = vsub.s32 4, %v91_v60 }
  0xa2   :  { %v93_v62 = vsub.s32 %v89_v58, %v92_v61  ;;  %v116_v22 = vsel %vm31_vm7, %v115_v19, %v91_v60 }
  0xa3   :  { %v118_v23 = vsel %vm30_vm8, 0, %v116_v22 }
  0xa4   :  { %v95_v63 = vsub.s32 0, %v93_v62  ;;  %v122_v25 = vadd.s32 3, %v118_v23  ;;  %v226_v28 = vand.u32 3, %v118_v23 }
  0xa6   :  { %v254_v0 = vmin.u32 %v95_v63, %v93_v62  ;;  %v123_v27 = vand.u32 3, %v122_v25  ;;  %vm231_vm11 = vcmp.eq.s32.totalorder %v226_v28, 2  ;;  %vm228_vm13 = vcmp.eq.s32.totalorder %v226_v28, 0 }
  0xa7   :  { %vm227_vm15 = vcmp.lt.s32.totalorder %v226_v28, 2 }
  0xa8   :  { %v97_v1 = vclz %v254_v0  ;;  %vm128_vm10 = vcmp.eq.s32.totalorder %v123_v27, 2  ;;  %vm125_vm12 = vcmp.eq.s32.totalorder %v123_v27, 0  ;;  %vm124_vm14 = vcmp.lt.s32.totalorder %v123_v27, 2 }
  0xaa   :  { %v255_v2 = vadd.s32 4294967294, %v97_v1 }
  0xac   :  { %vm256_vm6 = vcmp.lt.s32.totalorder %v255_v2, 0 }
  0xad   :  { %v100_v3 = vsel %vm256_vm6, 0, %v255_v2 }
  0xae   :  { %v101_v6 = vsub.s32 32, %v100_v3  ;;  %v105_v7 = vsub.s32 4294967266, %v100_v3  ;;  %v102_v8 = vshll.u32 %v93_v62, %v100_v3 }
  0xb0   :  { %v103_v10 = vshrl.u32 %v85_v5, %v101_v6  ;;  %v106_v11 = vadd.s32 127, %v105_v7 }
  0xb2   :  { %v104_v12 = vor.u32 %v103_v10, %v102_v8  ;;  %v107_v13 = vshll.u32 %v106_v11, 23 }
  0xb4   :  { %v108_v14 = vor.u32 4788187, %v107_v13  ;;  %v111_v16 = vcvt.s32.f32 %v104_v12 }
  0xb6   :  { %v109_v15 = vand.u32 2147483647, %v108_v14 }
  0xb8   :  { %v112_v17 = vmul.f32 %v111_v16, %v109_v15 }
  0xba   :  { %v113_v18 = vxor.u32 2147483648, %v112_v17 }
  0xbc   :  { %v114_v20 = vsel %vm31_vm7, %v113_v18, %v112_v17 }
  0xbd   :  { %v117_v21 = vsel %vm30_vm8, %v329_v4, %v114_v20 }
  0xbe   :  { %274 = vcosq.f32 %v117_v21 }
  0xbf   :  { %276 = vsinq.f32 %v117_v21 }
  0xcb   :  { %v275_v29 = vpop.eup %274 }
  0xcc   :  { %v277_v30 = vpop.eup %276  ;;  %v129_v31 = vxor.u32 2147483648, %v275_v29 }
  0xcd   :  { %v126_v32 = vxor.u32 2147483648, %v277_v30 }
  0xce   :  { %v130_v9 = vsel %vm128_vm10, %v129_v31, %v277_v30  ;;  %v233_v33 = vsel %vm231_vm11, %v129_v31, %v277_v30 }
  0xcf   :  { %v127_v34 = vsel %vm125_vm12, %v275_v29, %v126_v32  ;;  %v230_v35 = vsel %vm228_vm13, %v275_v29, %v126_v32 }
  0xd0   :  { %v131_v36 = vsel %vm124_vm14, %v127_v34, %v130_v9  ;;  %v234_v37 = vsel %vm227_vm15, %v230_v35, %v233_v33 }
  0xd1   :  { %v132_v38 = vsel %vm121_vm0, nan, %v131_v36  ;;  %v235_v39 = vsel %vm121_vm0, nan, %v234_v37 }
  0xd2   :  { %v236_v40 = vsel %vm28_vm9, %v132_v38, %v235_v39 }
  0xd3   :  { %237 = vst [vmem:[#allocation2] sm:$0xff] %v236_v40 }
  0xd4   :  { %289 = shalt.err (!%p286_p4)
}
  0xd5   :  { %247 = dma.vmem_to_hbm [thread:$0]  %s245_s1, 128, %s356_s2, [#allocation3]  }
  0xd6   :  { %298 = dma.done.wait [#allocation3], 128  }
  0xd7   :  { %299 = vsyncadd [#allocation3], 4294967168 }
  0xd8   :  { %251 = vsyncpa [#allocation3], 1 }

</bundles_post_ra>
